<compile_context>
chip_gen: v6e
topology: v6e:2x2x1
jax: 0.10.0
libtpu: 0.0.40
codegen_flags: <defaults>
</compile_context>

<pallas_src>
import jax
import jax.numpy as jnp
from jax.experimental import pallas as pl
from jax.experimental.pallas import tpu as pltpu

_TILE_BYTE_CAP = 6 * 1024 * 1024   # per-tile footprint cap (~6 MiB)
_VMEM_LIMIT = 48 * 1024 * 1024     # raised scoped-VMEM limit
_MAX_LANES = 4096                  # widest row we tile directly


def _bias_correction_kernel(w_ref, b_ref, x_ref, o_ref):
    # w_ref, b_ref live in SMEM as shape-(1,) f32 scalars.
    w = w_ref[0]
    b = b_ref[0]
    # One fused multiply-add per vreg on the VPU; mem-bound, nothing else
    # belongs in the body.
    o_ref[...] = (x_ref[...] * w + b).astype(o_ref.dtype)


def _round_up(a, m):
    return ((a + m - 1) // m) * m


def bias_correction(x, weight, bias):
    """Applies y = weight * x + bias elementwise via a Pallas TPU kernel."""
    orig_shape = x.shape
    dtype = x.dtype
    total = int(x.size)

    # The module's default init is the identity map: skip the HBM round trip.
    if (isinstance(weight, (int, float)) and isinstance(bias, (int, float))
            and float(weight) == 1.0 and float(bias) == 0.0):
        return x

    # Empty input guard (rows=0 would otherwise produce a degenerate grid).
    if total == 0:
        return x

    w = jnp.asarray(weight, jnp.float32).reshape((1,))
    b = jnp.asarray(bias, jnp.float32).reshape((1,))

    # ---- choose a 2-D slab view of x, avoiding copies wherever possible ----
    pad = 0
    lanes = None
    for cand in (512, 256, 128):
        if total % cand == 0:
            lanes = cand
            break
    if lanes is not None:
        rows = total // lanes
        x_slab = x.reshape((rows, lanes))                    # free reshape
    elif x.ndim >= 2 and orig_shape[-1] <= _MAX_LANES:
        lanes = int(orig_shape[-1])
        rows = total // lanes
        x_slab = x.reshape((rows, lanes))                    # free reshape
    elif total <= _MAX_LANES:
        lanes = total
        rows = 1
        x_slab = x.reshape((1, total))                       # free reshape
    else:
        # Rare fallback: large array with an awkward 1-D shape -> pad-flatten.
        lanes = 512
        rows = pl.cdiv(total, lanes)
        pad = rows * lanes - total
        x_slab = jnp.pad(x.reshape((-1,)), (0, pad)).reshape((rows, lanes))

    # ---- dtype-aware row tiling ----
    itemsize = jnp.dtype(dtype).itemsize
    sub = max(8, 32 // max(itemsize, 1))       # 8 (f32), 16 (bf16), 32 (int8)
    row_bytes = lanes * itemsize
    tm_cap = max(sub, (_TILE_BYTE_CAP // row_bytes) // sub * sub)
    data_bytes = rows * row_bytes

    if rows > tm_cap:
        TM = tm_cap                                        # multi-tile grid
    elif rows >= 2 * sub and data_bytes >= (1 << 20):
        # Single tile would leave one of v7x's two TensorCores idle: split.
        TM = _round_up(pl.cdiv(rows, 2), sub)
    else:
        TM = rows                                          # one full-extent tile
    grid = (pl.cdiv(rows, TM),)

    out_slab = pl.pallas_call(
        _bias_correction_kernel,
        out_shape=jax.ShapeDtypeStruct((rows, lanes), dtype),
        grid=grid,
        in_specs=[
            pl.BlockSpec(memory_space=pltpu.MemorySpace.SMEM),  # weight scalar
            pl.BlockSpec(memory_space=pltpu.MemorySpace.SMEM),  # bias scalar
            pl.BlockSpec((TM, lanes), lambda i: (i, 0)),
        ],
        out_specs=pl.BlockSpec((TM, lanes), lambda i: (i, 0)),
        compiler_params=pltpu.CompilerParams(
            dimension_semantics=("parallel",),
            vmem_limit_bytes=_VMEM_LIMIT,
        ),
        cost_estimate=pl.CostEstimate(
            flops=2 * total,
            transcendentals=0,
            bytes_accessed=2 * total * itemsize,
        ),
    )(w, b, x_slab)

    if pad:
        return out_slab.reshape((-1,))[:total].reshape(orig_shape)
    return out_slab.reshape(orig_shape)


if __name__ == "__main__":
    key = jax.random.PRNGKey(0)

    # --- module-default (identity) parameters: weight=1.0, bias=0.0 ---
    B, N = 2, 8
    x = jax.random.normal(key, (B, N), dtype=jnp.float32)
    y_id = jax.block_until_ready(bias_correction(x, 1.0, 0.0))
    assert y_id.shape == (B, N)
    assert jnp.allclose(y_id, x), "identity path mismatch"

    # --- same small shape, non-trivial params -> exercises the kernel ---
    y = jax.block_until_ready(bias_correction(x, 0.75, 0.25))
    assert y.shape == (B, N)
    assert jnp.allclose(y, 0.75 * x + 0.25, atol=1e-6), "small-shape mismatch"

    # --- copy-free lane-dense path (16*1000 is a multiple of 128) ---
    key2 = jax.random.PRNGKey(1)
    B2, N2 = 16, 1000
    x2 = jax.random.normal(key2, (B2, N2), dtype=jnp.float32)
    w2, b2 = 1.25, -0.5
    y2 = jax.block_until_ready(bias_correction(x2, w2, b2))
    assert y2.shape == (B2, N2)
    assert jnp.allclose(y2, w2 * x2 + b2, atol=1e-5), "lane-dense mismatch"

    # --- ragged direct-2D path (last dim not a multiple of 128, no padding) ---
    key3 = jax.random.PRNGKey(2)
    B3, N3 = 33, 77
    x3 = jax.random.normal(key3, (B3, N3), dtype=jnp.float32)
    y3 = jax.block_until_ready(bias_correction(x3, 2.0, 3.0))
    assert y3.shape == (B3, N3)
    assert jnp.allclose(y3, 2.0 * x3 + 3.0, atol=1e-5), "ragged-2D mismatch"

    # --- multi-tile grid + bf16 (dtype-aware tiling, >=2 grid steps) ---
    key4 = jax.random.PRNGKey(3)
    B4, N4 = 512, 1024
    x4 = jax.random.normal(key4, (B4, N4), dtype=jnp.bfloat16)
    w4, b4 = 0.5, 1.5
    y4 = jax.block_until_ready(bias_correction(x4, w4, b4))
    assert y4.shape == (B4, N4)
    assert jnp.allclose(
        y4.astype(jnp.float32),
        w4 * x4.astype(jnp.float32) + b4,
        atol=2e-2,
    ), "bf16 multi-tile mismatch"

    print("KERNEL_OK")
</pallas_src>

<mosaic_0001>
module attributes {stable_mosaic.version = 11 : i64} {
  func.func @_bias_correction_kernel(%arg0: i32, %arg1: memref<1xf32, #tpu.memory_space<smem>>, %arg2: memref<1xf32, #tpu.memory_space<smem>>, %arg3: memref<2x8xf32, #tpu.memory_space<vmem>>, %arg4: memref<2x8xf32, #tpu.memory_space<vmem>>) attributes {dimension_semantics = [#tpu.dimension_semantics<parallel>], iteration_bounds = array<i64: 1>, scalar_prefetch = 0 : i64, scratch_operands = 0 : i64, tpu.core_type = #tpu.core_type<tc>, window_params = [{transform_indices = @transform_0, window_bounds = array<i64: 1>}, {transform_indices = @transform_1, window_bounds = array<i64: 1>}, {transform_indices = @transform_2, window_bounds = array<i64: 2, 8>}, {transform_indices = @transform_3, window_bounds = array<i64: 2, 8>}]} {
    %c0 = arith.constant 0 : index
    %0 = memref.load %arg1[%c0] : memref<1xf32, #tpu.memory_space<smem>>
    %c0_0 = arith.constant 0 : index
    %1 = memref.load %arg2[%c0_0] : memref<1xf32, #tpu.memory_space<smem>>
    %c0_1 = arith.constant 0 : index
    %c0_2 = arith.constant 0 : index
    %2 = vector.load %arg3[%c0_1, %c0_2] : memref<2x8xf32, #tpu.memory_space<vmem>>, vector<2x8xf32>
    %3 = vector.broadcast %0 : f32 to vector<2x8xf32>
    %4 = arith.mulf %2, %3 : vector<2x8xf32>
    %5 = vector.broadcast %1 : f32 to vector<2x8xf32>
    %6 = arith.addf %4, %5 : vector<2x8xf32>
    %c0_3 = arith.constant 0 : index
    %c0_4 = arith.constant 0 : index
    %7 = vector.load %arg4[%c0_3, %c0_4] : memref<2x8xf32, #tpu.memory_space<vmem>>, vector<2x8xf32>
    tpu.vector_store %arg4[%c0_3, %c0_4], %6 {strides = array<i32>} : memref<2x8xf32, #tpu.memory_space<vmem>>, vector<2x8xf32>,
    return
  }
  func.func @transform_0(%arg0: i32) -> i32 {
    %c0_i32 = arith.constant 0 : i32
    %c0_i32_0 = arith.constant 0 : i32
    return %c0_i32 : i32
  }
  func.func @transform_1(%arg0: i32) -> i32 {
    %c0_i32 = arith.constant 0 : i32
    %c0_i32_0 = arith.constant 0 : i32
    return %c0_i32 : i32
  }
  func.func @transform_2(%arg0: i32) -> (i32, i32) {
    %c0_i32 = arith.constant 0 : i32
    %c0_i32_0 = arith.constant 0 : i32
    return %arg0, %c0_i32 : i32, i32
  }
  func.func @transform_3(%arg0: i32) -> (i32, i32) {
    %c0_i32 = arith.constant 0 : i32
    %c0_i32_0 = arith.constant 0 : i32
    return %arg0, %c0_i32 : i32, i32
  }
}

</mosaic_0001>

<bundles_post_ra>
// kernel: tpu_custom_call.1
= control target key start
LH: loop header
LB: loop body
LE: loop exit
PB: predicated region body
PF: predicated region fallthrough
CT: control target
= control target key end

     0   :  { %s96_s0 = inlined_call_operand.<no memory space> [shape: f32[1], index: 0, kind: input, shape index: {}]   ;;  %s97_s1 = inlined_call_operand.<no memory space> [shape: f32[1], index: 1, kind: input, shape index: {}]   ;;  %s98_s2 = inlined_call_operand.vmem [shape: f32[2,8], index: 2, kind: input, shape index: {}]   ;;  %s99_s3 = inlined_call_operand.hbm [shape: f32[2,8], index: 3, kind: output, shape index: {}]  }
   0x1   :  { %v19_v0 = vld [vmem:[%s98_s2] sm:$0x3]  ;;  %v20_v1 = vstv %s96_s0  ;;  %v22_v2 = vstv %s97_s1 }
   0x2   :  { %10 = vsyncpa [#allocation5], 0  ;;  %v21_v3 = vmul.f32 %v20_v1, %v19_v0  ;;  %s63_s18 = smov [#allocation4]   ;;  %vm24_vm0 = vcmask 58368  }
   0x3   :  { %s32_s19 = sshll.u32 %s63_s18, 4  ;;  %s33_s19 = int_to_ptr.vmem [resolvable:$true] %s32_s19 }
   0x4   :  { %v23_v4 = vadd.f32 %v22_v2, %v21_v3  ;;  %s41_s20 = scalar_lea.vmem %s33_s19, 32  ;;  %p46_p1 = scmp.lt.s32.totalorder %s33_s19, %s33_s19 }
   0x5   :  { %p42_p0 = scmp.ne.s32.totalorder %s33_s19, %s41_s20  ;;  %p47_p2 = scmp.lt.s32.totalorder %s41_s20, %s41_s20 }
   0x6   :  { %25 = vst.msk [vmem:[#allocation4] sm:$0x3] %vm24_vm0, %v23_v4 }
   0x7   :  { %p48_p3 = por %p47_p2, %p46_p1 }
   0x9   :  { %p49_p4 = pnand %p48_p3, %p42_p0 }
   0xb   :  { %52 = shalt.err (!%p49_p4)
}
   0xc   :  { %35 = dma.vmem_to_hbm [thread:$0]  %s33_s19, 32, %s99_s3, [#allocation5]  }
   0xd   :  { %61 = dma.done.wait [#allocation5], 32  }
   0xe   :  { %62 = vsyncadd [#allocation5], 4294967264 }
   0xf   :  { %39 = vsyncpa [#allocation5], 1 }

</bundles_post_ra>
